<compile_context>
chip_gen: v7x
topology: tpu7x:2x2x1
jax: 0.10.0
libtpu: 0.0.40
codegen_flags: <defaults>
</compile_context>

<pallas_src>
import functools

import numpy as np
import jax
import jax.numpy as jnp
from jax.experimental import pallas as pl
from jax.experimental.pallas import tpu as pltpu

# ----------------------- model hyper-params (small, deterministic) -----------
DIM = 64                      # C
NUM_HEADS = 8
HEAD_DIM = DIM // NUM_HEADS   # 8
SCALE = HEAD_DIM ** (-0.5)
REGION_NUM = 2                # region_size=0 in module -> use region_num


# ----------------------------- Pallas kernel ---------------------------------
def _inner_attention_kernel(x_ref, wq_ref, wk_ref, wv_ref, bq_ref, bk_ref,
                            bv_ref, wp_ref, bp_ref, o_ref, *, num_heads):
    """One block of RB regions per grid step.

    x_ref:  (RB, N, C)   bf16 token block (RB regions x N tokens)
    wq/wk/wv_ref: (nh, C, hd)  bf16, head-major; qk scale folded into wq
    bq/bk/bv_ref: (nh, 1, hd)  f32 (scale folded into bq)
    wp_ref: (nh, hd, C)  bf16, head-major output projection
    bp_ref: (1, C)       f32
    o_ref:  (RB, N, C)   f32 output block
    """
    rb, n, c = x_ref.shape
    hd = wq_ref.shape[-1]
    m = rb * n

    # Token-row matrix for the projections (leading-dim merge, layout-free
    # because N is a multiple of the sublane tile).
    x = x_ref[...].reshape(m, c)                                   # bf16

    def head_body(h, acc):
        # Head-major weight slices: MXU projections straight into (M, hd),
        # no narrow lane extracts from a fused qkv result.
        q = jnp.dot(x, wq_ref[h], preferred_element_type=jnp.float32) + bq_ref[h]
        k = jnp.dot(x, wk_ref[h], preferred_element_type=jnp.float32) + bk_ref[h]
        v = jnp.dot(x, wv_ref[h], preferred_element_type=jnp.float32) + bv_ref[h]
        q3 = q.astype(jnp.bfloat16).reshape(rb, n, hd)
        k3 = k.astype(jnp.bfloat16).reshape(rb, n, hd)
        v3 = v.astype(jnp.bfloat16).reshape(rb, n, hd)

        # Region-batched attention: (rb, n, n) scores per head; tokens never
        # see other regions, so no block-diagonal mask / iota is needed.
        s = jnp.einsum('rqd,rkd->rqk', q3, k3,
                       preferred_element_type=jnp.float32)         # (rb, n, n) f32
        s = s - jnp.max(s, axis=-1, keepdims=True)
        p = jnp.exp(s)
        inv = pl.reciprocal(jnp.sum(p, axis=-1, keepdims=True), approx=True)
        p = (p * inv).astype(jnp.bfloat16)
        o_h = jnp.einsum('rqk,rkd->rqd', p, v3,
                         preferred_element_type=jnp.float32)        # (rb, n, hd)

        # Fold this head directly into the output projection: the only value
        # alive across head iterations is the (M, C) f32 accumulator.
        return acc + jnp.dot(o_h.reshape(m, hd).astype(jnp.bfloat16), wp_ref[h],
                             preferred_element_type=jnp.float32)

    acc = jax.lax.fori_loop(0, num_heads, head_body,
                            jnp.zeros((m, c), jnp.float32))
    o_ref[...] = (acc + bp_ref[...]).reshape(rb, n, c).astype(o_ref.dtype)


def _pick_regions_per_block(R, N, max_rows=256, min_steps=4):
    """Largest RB with R % RB == 0 and RB*N <= max_rows, preferring >= min_steps
    grid steps so v7x's two TensorCores each get at least two steps."""
    cands = [rb for rb in range(R, 0, -1) if R % rb == 0 and rb * N <= max_rows]
    if not cands:
        return 1
    multi = [rb for rb in cands if R // rb >= min_steps]
    return max(multi) if multi else max(cands)


def prepare_params(wqkv, bqkv, wproj, bproj):
    """One-time parameter preparation (NOT per forward):
    split qkv into head-major Wq/Wk/Wv, fold the qk scale into Wq/bq,
    reorder the projection head-major, pre-cast weights to bf16 (biases f32)."""
    d = NUM_HEADS * HEAD_DIM
    wq = (wqkv[:, :d] * SCALE).reshape(DIM, NUM_HEADS, HEAD_DIM).transpose(1, 0, 2)
    wk = wqkv[:, d:2 * d].reshape(DIM, NUM_HEADS, HEAD_DIM).transpose(1, 0, 2)
    wv = wqkv[:, 2 * d:].reshape(DIM, NUM_HEADS, HEAD_DIM).transpose(1, 0, 2)
    bq = (bqkv[:d] * SCALE).reshape(NUM_HEADS, 1, HEAD_DIM)
    bk = bqkv[d:2 * d].reshape(NUM_HEADS, 1, HEAD_DIM)
    bv = bqkv[2 * d:].reshape(NUM_HEADS, 1, HEAD_DIM)
    wp = wproj.reshape(NUM_HEADS, HEAD_DIM, DIM)
    bp = bproj.reshape(1, DIM)
    bf = lambda a: a.astype(jnp.bfloat16)
    f32 = lambda a: a.astype(jnp.float32)
    return (bf(wq), bf(wk), bf(wv), f32(bq), f32(bk), f32(bv), bf(wp), f32(bp))


def inner_attention_pallas(x_regions, prepared):
    """x_regions: (R, N, C) f32; prepared: output of prepare_params."""
    R, N, C = x_regions.shape
    wq, wk, wv, bq, bk, bv, wp, bp = prepared
    nh, _, hd = wq.shape

    rb = _pick_regions_per_block(R, N)
    grid = (R // rb,)

    # Pre-cast x to bf16 in the wrapper: halves the x DMA bytes; all matmul
    # accumulation inside the kernel stays f32.
    x_bf = x_regions.astype(jnp.bfloat16)

    rep3 = lambda shape: pl.BlockSpec(shape, lambda i: (0, 0, 0))
    kernel = functools.partial(_inner_attention_kernel, num_heads=nh)

    # TODO(synk): if profiling shows the in/out DMA or store path exposed,
    # pack two token rows per 128-lane row ((R*N,64)->(R*N/2,128)) wrapper-side.
    out = pl.pallas_call(
        kernel,
        out_shape=jax.ShapeDtypeStruct((R, N, C), x_regions.dtype),
        grid=grid,
        in_specs=[
            pl.BlockSpec((rb, N, C), lambda i: (i, 0, 0)),   # x block
            rep3((nh, C, hd)),                               # wq
            rep3((nh, C, hd)),                               # wk
            rep3((nh, C, hd)),                               # wv
            rep3((nh, 1, hd)),                               # bq
            rep3((nh, 1, hd)),                               # bk
            rep3((nh, 1, hd)),                               # bv
            rep3((nh, hd, C)),                               # wproj
            pl.BlockSpec((1, C), lambda i: (0, 0)),          # bproj
        ],
        out_specs=pl.BlockSpec((rb, N, C), lambda i: (i, 0, 0)),
        compiler_params=pltpu.CompilerParams(
            dimension_semantics=("parallel",),
            vmem_limit_bytes=32 * 1024 * 1024),
    )(x_bf, wq, wk, wv, bq, bk, bv, wp, bp)
    return out


# ------------------------------ glue (plain JAX / numpy) ----------------------
def _padding_meta(L, region_size, region_num, min_region_num=0, min_region_ratio=0.0):
    H = W = int(np.ceil(np.sqrt(L)))
    if region_size is not None:
        _n = -H % region_size
        H, W = H + _n, W + _n
        rn, rs = int(H // region_size), region_size
    else:
        _n = -H % region_num
        H, W = H + _n, W + _n
        rs, rn = int(H // region_num), region_num
    add_length = H * W - L
    if add_length > L / (min_region_ratio + 1e-8) or L < min_region_num:
        H = W = int(np.ceil(np.sqrt(L)))
        _n = -H % 2
        H, W = H + _n, W + _n
        add_length = H * W - L
        rs = H
    return H, W, add_length, rn, rs


def region_partition(x, rs):
    B, H, W, C = x.shape
    x = x.reshape(B, H // rs, rs, W // rs, rs, C)
    return x.transpose(0, 1, 3, 2, 4, 5).reshape(-1, rs, rs, C)


def region_reverse(regions, rs, H, W):
    B = regions.shape[0] // ((H // rs) * (W // rs))
    x = regions.reshape(B, H // rs, W // rs, rs, rs, -1)
    return x.transpose(0, 1, 3, 2, 4, 5).reshape(B, H, W, -1)


# TODO(synk): region_partition/region_reverse are wrapper-side XLA transposes;
# they could be fused into the kernel via a PrefetchScalarGridSpec row-offset
# gather if the HBM round trip ever dominates.
def region_attention_forward(x, prepared, region_size=None, region_num=REGION_NUM):
    B, L, C = x.shape
    H, W, add_length, rn, rs = _padding_meta(L, region_size, region_num)
    if add_length > 0:
        x = jnp.concatenate([x, jnp.zeros((B, add_length, C), x.dtype)], axis=1)
    xi = x.reshape(B, H, W, C)
    xr = region_partition(xi, rs).reshape(-1, rs * rs, C)
    attn = inner_attention_pallas(xr, prepared)
    attn = attn.reshape(-1, rs, rs, C)
    xo = region_reverse(attn, rs, H, W).reshape(-1, H * W, C)
    if add_length > 0:
        xo = xo[:, :-add_length]
    return xo


# ------------------------------ pure-JAX reference ---------------------------
def _inner_attention_ref(x, wqkv, bqkv, wproj, bproj):
    B_, N, C = x.shape
    qkv = x @ wqkv + bqkv                                     # (B_, N, 3*nh*hd)
    qkv = qkv.reshape(B_, N, 3, NUM_HEADS, HEAD_DIM).transpose(2, 0, 3, 1, 4)
    q, k, v = qkv[0] * SCALE, qkv[1], qkv[2]
    a = jnp.einsum('bhqd,bhkd->bhqk', q, k)
    a = jax.nn.softmax(a, axis=-1)
    o = jnp.einsum('bhqk,bhkd->bhqd', a, v)
    o = o.transpose(0, 2, 1, 3).reshape(B_, N, NUM_HEADS * HEAD_DIM)
    return o @ wproj + bproj


def region_attention_forward_ref(x, params, region_size=None, region_num=REGION_NUM):
    wqkv, bqkv, wproj, bproj = params
    B, L, C = x.shape
    H, W, add_length, rn, rs = _padding_meta(L, region_size, region_num)
    if add_length > 0:
        x = jnp.concatenate([x, jnp.zeros((B, add_length, C), x.dtype)], axis=1)
    xi = x.reshape(B, H, W, C)
    xr = region_partition(xi, rs).reshape(-1, rs * rs, C)
    attn = _inner_attention_ref(xr, wqkv, bqkv, wproj, bproj)
    attn = attn.reshape(-1, rs, rs, C)
    xo = region_reverse(attn, rs, H, W).reshape(-1, H * W, C)
    if add_length > 0:
        xo = xo[:, :-add_length]
    return xo


# ----------------------------------- main -------------------------------------
if __name__ == "__main__":
    key = jax.random.PRNGKey(0)
    kx, k1, k2, k3, k4 = jax.random.split(key, 5)

    # L=64 -> H=W=8, region_size=4, N=16 tokens/region, R=16 regions total.
    # The kernel blocks 4 regions (64 token rows) per grid step, grid=(4,).
    B, L, C = 4, 64, DIM
    x = jax.random.normal(kx, (B, L, C), dtype=jnp.float32)

    # Deterministic synthetic parameters (nn.Linear layouts stored as (in, out)).
    d = NUM_HEADS * HEAD_DIM
    wqkv = jax.random.normal(k1, (C, 3 * d), dtype=jnp.float32) * 0.05
    bqkv = jax.random.normal(k2, (3 * d,), dtype=jnp.float32) * 0.05
    wproj = jax.random.normal(k3, (d, C), dtype=jnp.float32) * 0.05
    bproj = jax.random.normal(k4, (C,), dtype=jnp.float32) * 0.05
    params = (wqkv, bqkv, wproj, bproj)

    # One-time parameter preparation (head-major split, scale fold, bf16 cast).
    prepared = jax.tree_util.tree_map(jax.block_until_ready, prepare_params(*params))

    out = jax.block_until_ready(region_attention_forward(x, prepared))
    ref = jax.block_until_ready(region_attention_forward_ref(x, params))

    assert out.shape == (B, L, C), out.shape
    # bf16 matmul operands + approx reciprocal -> relaxed tolerance vs f32 ref.
    np.testing.assert_allclose(np.asarray(out), np.asarray(ref), rtol=2e-2, atol=2e-2)

    print("KERNEL_OK")
</pallas_src>

<mosaic_0001>
module attributes {stable_mosaic.version = 11 : i64} {
  func.func @_inner_attention_kernel(%arg0: i32, %arg1: memref<4x16x64xbf16, #tpu.memory_space<vmem>>, %arg2: memref<8x64x8xbf16, #tpu.memory_space<vmem>>, %arg3: memref<8x64x8xbf16, #tpu.memory_space<vmem>>, %arg4: memref<8x64x8xbf16, #tpu.memory_space<vmem>>, %arg5: memref<8x1x8xf32, #tpu.memory_space<vmem>>, %arg6: memref<8x1x8xf32, #tpu.memory_space<vmem>>, %arg7: memref<8x1x8xf32, #tpu.memory_space<vmem>>, %arg8: memref<8x8x64xbf16, #tpu.memory_space<vmem>>, %arg9: memref<1x64xf32, #tpu.memory_space<vmem>>, %arg10: memref<4x16x64xf32, #tpu.memory_space<vmem>>) attributes {dimension_semantics = [#tpu.dimension_semantics<parallel>], iteration_bounds = array<i64: 4>, scalar_prefetch = 0 : i64, scratch_operands = 0 : i64, tpu.core_type = #tpu.core_type<tc>, window_params = [{transform_indices = @transform_0, window_bounds = array<i64: 4, 16, 64>}, {pipeline_mode = #tpu.pipeline_mode<synchronous>, transform_indices = @transform_1, window_bounds = array<i64: 8, 64, 8>}, {pipeline_mode = #tpu.pipeline_mode<synchronous>, transform_indices = @transform_2, window_bounds = array<i64: 8, 64, 8>}, {pipeline_mode = #tpu.pipeline_mode<synchronous>, transform_indices = @transform_3, window_bounds = array<i64: 8, 64, 8>}, {pipeline_mode = #tpu.pipeline_mode<synchronous>, transform_indices = @transform_4, window_bounds = array<i64: 8, 1, 8>}, {pipeline_mode = #tpu.pipeline_mode<synchronous>, transform_indices = @transform_5, window_bounds = array<i64: 8, 1, 8>}, {pipeline_mode = #tpu.pipeline_mode<synchronous>, transform_indices = @transform_6, window_bounds = array<i64: 8, 1, 8>}, {pipeline_mode = #tpu.pipeline_mode<synchronous>, transform_indices = @transform_7, window_bounds = array<i64: 8, 8, 64>}, {pipeline_mode = #tpu.pipeline_mode<synchronous>, transform_indices = @transform_8, window_bounds = array<i64: 1, 64>}, {transform_indices = @transform_9, window_bounds = array<i64: 4, 16, 64>}]} {
    %c0 = arith.constant 0 : index
    %c0_0 = arith.constant 0 : index
    %c0_1 = arith.constant 0 : index
    %0 = vector.load %arg1[%c0, %c0_0, %c0_1] : memref<4x16x64xbf16, #tpu.memory_space<vmem>>, vector<4x16x64xbf16>
    %1 = vector.shape_cast %0 : vector<4x16x64xbf16> to vector<64x64xbf16>
    %cst = arith.constant 0.000000e+00 : f32
    %2 = vector.broadcast %cst : f32 to vector<64x64xf32>
    %c0_i32 = arith.constant 0 : i32
    %c8_i32 = arith.constant 8 : i32
    %3 = arith.addi %c0_i32, %c8_i32 : i32
    %c1_i32 = arith.constant 1 : i32
    %4 = scf.for %arg11 = %c0_i32 to %3 step %c1_i32 iter_args(%arg12 = %2) -> (vector<64x64xf32>)  : i32 {
      %10 = arith.index_cast %arg11 : i32 to index
      %c0_8 = arith.constant 0 : index
      %c0_9 = arith.constant 0 : index
      %11 = vector.load %arg2[%10, %c0_8, %c0_9] : memref<8x64x8xbf16, #tpu.memory_space<vmem>>, vector<1x64x8xbf16>
      %12 = vector.shape_cast %11 : vector<1x64x8xbf16> to vector<64x8xbf16>
      %cst_10 = arith.constant dense<0.000000e+00> : vector<64x8xf32>
      %13 = tpu.matmul %1, %12, %cst_10 {dimension_numbers = #tpu.dot_dimension_numbers<[1], [0], [0], [1], [0, 0, 1, 1], [], []>} : vector<64x64xbf16>, vector<64x8xbf16>, vector<64x8xf32> -> vector<64x8xf32>
      %14 = arith.index_cast %arg11 : i32 to index
      %c0_11 = arith.constant 0 : index
      %c0_12 = arith.constant 0 : index
      %15 = vector.load %arg5[%14, %c0_11, %c0_12] : memref<8x1x8xf32, #tpu.memory_space<vmem>>, vector<1x1x8xf32>
      %16 = vector.shape_cast %15 : vector<1x1x8xf32> to vector<1x8xf32>
      %17 = vector.broadcast %16 : vector<1x8xf32> to vector<64x8xf32>
      %18 = arith.addf %13, %17 : vector<64x8xf32>
      %19 = arith.index_cast %arg11 : i32 to index
      %c0_13 = arith.constant 0 : index
      %c0_14 = arith.constant 0 : index
      %20 = vector.load %arg3[%19, %c0_13, %c0_14] : memref<8x64x8xbf16, #tpu.memory_space<vmem>>, vector<1x64x8xbf16>
      %21 = vector.shape_cast %20 : vector<1x64x8xbf16> to vector<64x8xbf16>
      %cst_15 = arith.constant dense<0.000000e+00> : vector<64x8xf32>
      %22 = tpu.matmul %1, %21, %cst_15 {dimension_numbers = #tpu.dot_dimension_numbers<[1], [0], [0], [1], [0, 0, 1, 1], [], []>} : vector<64x64xbf16>, vector<64x8xbf16>, vector<64x8xf32> -> vector<64x8xf32>
      %23 = arith.index_cast %arg11 : i32 to index
      %c0_16 = arith.constant 0 : index
      %c0_17 = arith.constant 0 : index
      %24 = vector.load %arg6[%23, %c0_16, %c0_17] : memref<8x1x8xf32, #tpu.memory_space<vmem>>, vector<1x1x8xf32>
      %25 = vector.shape_cast %24 : vector<1x1x8xf32> to vector<1x8xf32>
      %26 = vector.broadcast %25 : vector<1x8xf32> to vector<64x8xf32>
      %27 = arith.addf %22, %26 : vector<64x8xf32>
      %28 = arith.index_cast %arg11 : i32 to index
      %c0_18 = arith.constant 0 : index
      %c0_19 = arith.constant 0 : index
      %29 = vector.load %arg4[%28, %c0_18, %c0_19] : memref<8x64x8xbf16, #tpu.memory_space<vmem>>, vector<1x64x8xbf16>
      %30 = vector.shape_cast %29 : vector<1x64x8xbf16> to vector<64x8xbf16>
      %cst_20 = arith.constant dense<0.000000e+00> : vector<64x8xf32>
      %31 = tpu.matmul %1, %30, %cst_20 {dimension_numbers = #tpu.dot_dimension_numbers<[1], [0], [0], [1], [0, 0, 1, 1], [], []>} : vector<64x64xbf16>, vector<64x8xbf16>, vector<64x8xf32> -> vector<64x8xf32>
      %32 = arith.index_cast %arg11 : i32 to index
      %c0_21 = arith.constant 0 : index
      %c0_22 = arith.constant 0 : index
      %33 = vector.load %arg7[%32, %c0_21, %c0_22] : memref<8x1x8xf32, #tpu.memory_space<vmem>>, vector<1x1x8xf32>
      %34 = vector.shape_cast %33 : vector<1x1x8xf32> to vector<1x8xf32>
      %35 = vector.broadcast %34 : vector<1x8xf32> to vector<64x8xf32>
      %36 = arith.addf %31, %35 : vector<64x8xf32>
      %37 = arith.truncf %18 : vector<64x8xf32> to vector<64x8xbf16>
      %38 = vector.shape_cast %37 : vector<64x8xbf16> to vector<4x16x8xbf16>
      %39 = arith.truncf %27 : vector<64x8xf32> to vector<64x8xbf16>
      %40 = vector.shape_cast %39 : vector<64x8xbf16> to vector<4x16x8xbf16>
      %41 = arith.truncf %36 : vector<64x8xf32> to vector<64x8xbf16>
      %42 = vector.shape_cast %41 : vector<64x8xbf16> to vector<4x16x8xbf16>
      "tpu.trace_start"() <{level = 10 : i32, message = "rqd,rkd->rqk"}> : () -> ()
      %cst_23 = arith.constant dense<0.000000e+00> : vector<4x16x16xf32>
      %43 = tpu.matmul %38, %40, %cst_23 {dimension_numbers = #tpu.dot_dimension_numbers<[2], [2], [1], [1], [0, 0, 0, 1, 1, 1], [0], [0]>} : vector<4x16x8xbf16>, vector<4x16x8xbf16>, vector<4x16x16xf32> -> vector<4x16x16xf32>
      "tpu.trace_stop"() : () -> ()
      %cst_24 = arith.constant dense<0xFF800000> : vector<4x16xf32>
      %44 = vector.multi_reduction <maximumf>, %43, %cst_24 [2] : vector<4x16x16xf32> to vector<4x16xf32>
      %45 = vector.shape_cast %44 : vector<4x16xf32> to vector<4x16x1xf32>
      %46 = vector.broadcast %45 : vector<4x16x1xf32> to vector<4x16x16xf32>
      %47 = arith.subf %43, %46 : vector<4x16x16xf32>
      %48 = math.exp %47 : vector<4x16x16xf32>
      %cst_25 = arith.constant dense<0.000000e+00> : vector<4x16xf32>
      %49 = vector.multi_reduction <add>, %48, %cst_25 [2] : vector<4x16x16xf32> to vector<4x16xf32>
      %50 = vector.shape_cast %49 : vector<4x16xf32> to vector<4x16x1xf32>
      %51 = tpu.reciprocal %50 {approx = true} : vector<4x16x1xf32> -> vector<4x16x1xf32>
      %52 = vector.broadcast %51 : vector<4x16x1xf32> to vector<4x16x16xf32>
      %53 = arith.mulf %48, %52 : vector<4x16x16xf32>
      %54 = arith.truncf %53 : vector<4x16x16xf32> to vector<4x16x16xbf16>
      "tpu.trace_start"() <{level = 10 : i32, message = "rqk,rkd->rqd"}> : () -> ()
      %cst_26 = arith.constant dense<0.000000e+00> : vector<4x16x8xf32>
      %55 = tpu.matmul %54, %42, %cst_26 {dimension_numbers = #tpu.dot_dimension_numbers<[2], [1], [1], [2], [0, 0, 0, 1, 1, 2], [0], [0]>} : vector<4x16x16xbf16>, vector<4x16x8xbf16>, vector<4x16x8xf32> -> vector<4x16x8xf32>
      "tpu.trace_stop"() : () -> ()
      %56 = vector.shape_cast %55 : vector<4x16x8xf32> to vector<64x8xf32>
      %57 = arith.truncf %56 : vector<64x8xf32> to vector<64x8xbf16>
      %58 = arith.index_cast %arg11 : i32 to index
      %c0_27 = arith.constant 0 : index
      %c0_28 = arith.constant 0 : index
      %59 = vector.load %arg8[%58, %c0_27, %c0_28] : memref<8x8x64xbf16, #tpu.memory_space<vmem>>, vector<1x8x64xbf16>
      %60 = vector.shape_cast %59 : vector<1x8x64xbf16> to vector<8x64xbf16>
      %cst_29 = arith.constant dense<0.000000e+00> : vector<64x64xf32>
      %61 = tpu.matmul %57, %60, %cst_29 {dimension_numbers = #tpu.dot_dimension_numbers<[1], [0], [0], [1], [0, 0, 1, 1], [], []>} : vector<64x8xbf16>, vector<8x64xbf16>, vector<64x64xf32> -> vector<64x64xf32>
      %62 = arith.addf %arg12, %61 : vector<64x64xf32>
      scf.yield %62 : vector<64x64xf32>
    }
    %c8_i32_2 = arith.constant 8 : i32
    %c0_3 = arith.constant 0 : index
    %c0_4 = arith.constant 0 : index
    %5 = vector.load %arg9[%c0_3, %c0_4] : memref<1x64xf32, #tpu.memory_space<vmem>>, vector<1x64xf32>
    %6 = vector.broadcast %5 : vector<1x64xf32> to vector<64x64xf32>
    %7 = arith.addf %4, %6 : vector<64x64xf32>
    %8 = vector.shape_cast %7 : vector<64x64xf32> to vector<4x16x64xf32>
    %c0_5 = arith.constant 0 : index
    %c0_6 = arith.constant 0 : index
    %c0_7 = arith.constant 0 : index
    %9 = vector.load %arg10[%c0_5, %c0_6, %c0_7] : memref<4x16x64xf32, #tpu.memory_space<vmem>>, vector<4x16x64xf32>
    tpu.vector_store %arg10[%c0_5, %c0_6, %c0_7], %8 {strides = array<i32>} : memref<4x16x64xf32, #tpu.memory_space<vmem>>, vector<4x16x64xf32>,
    return
  }
  func.func @transform_0(%arg0: i32) -> (i32, i32, i32) {
    %c0_i32 = arith.constant 0 : i32
    %c0_i32_0 = arith.constant 0 : i32
    %c0_i32_1 = arith.constant 0 : i32
    return %arg0, %c0_i32, %c0_i32_0 : i32, i32, i32
  }
  func.func @transform_1(%arg0: i32) -> (i32, i32, i32) {
    %c0_i32 = arith.constant 0 : i32
    %c0_i32_0 = arith.constant 0 : i32
    %c0_i32_1 = arith.constant 0 : i32
    %c0_i32_2 = arith.constant 0 : i32
    return %c0_i32, %c0_i32_0, %c0_i32_1 : i32, i32, i32
  }
  func.func @transform_2(%arg0: i32) -> (i32, i32, i32) {
    %c0_i32 = arith.constant 0 : i32
    %c0_i32_0 = arith.constant 0 : i32
    %c0_i32_1 = arith.constant 0 : i32
    %c0_i32_2 = arith.constant 0 : i32
    return %c0_i32, %c0_i32_0, %c0_i32_1 : i32, i32, i32
  }
  func.func @transform_3(%arg0: i32) -> (i32, i32, i32) {
    %c0_i32 = arith.constant 0 : i32
    %c0_i32_0 = arith.constant 0 : i32
    %c0_i32_1 = arith.constant 0 : i32
    %c0_i32_2 = arith.constant 0 : i32
    return %c0_i32, %c0_i32_0, %c0_i32_1 : i32, i32, i32
  }
  func.func @transform_4(%arg0: i32) -> (i32, i32, i32) {
    %c0_i32 = arith.constant 0 : i32
    %c0_i32_0 = arith.constant 0 : i32
    %c0_i32_1 = arith.constant 0 : i32
    %c0_i32_2 = arith.constant 0 : i32
    return %c0_i32, %c0_i32_0, %c0_i32_1 : i32, i32, i32
  }
  func.func @transform_5(%arg0: i32) -> (i32, i32, i32) {
    %c0_i32 = arith.constant 0 : i32
    %c0_i32_0 = arith.constant 0 : i32
    %c0_i32_1 = arith.constant 0 : i32
    %c0_i32_2 = arith.constant 0 : i32
    return %c0_i32, %c0_i32_0, %c0_i32_1 : i32, i32, i32
  }
  func.func @transform_6(%arg0: i32) -> (i32, i32, i32) {
    %c0_i32 = arith.constant 0 : i32
    %c0_i32_0 = arith.constant 0 : i32
    %c0_i32_1 = arith.constant 0 : i32
    %c0_i32_2 = arith.constant 0 : i32
    return %c0_i32, %c0_i32_0, %c0_i32_1 : i32, i32, i32
  }
  func.func @transform_7(%arg0: i32) -> (i32, i32, i32) {
    %c0_i32 = arith.constant 0 : i32
    %c0_i32_0 = arith.constant 0 : i32
    %c0_i32_1 = arith.constant 0 : i32
    %c0_i32_2 = arith.constant 0 : i32
    return %c0_i32, %c0_i32_0, %c0_i32_1 : i32, i32, i32
  }
  func.func @transform_8(%arg0: i32) -> (i32, i32) {
    %c0_i32 = arith.constant 0 : i32
    %c0_i32_0 = arith.constant 0 : i32
    %c0_i32_1 = arith.constant 0 : i32
    return %c0_i32, %c0_i32_0 : i32, i32
  }
  func.func @transform_9(%arg0: i32) -> (i32, i32, i32) {
    %c0_i32 = arith.constant 0 : i32
    %c0_i32_0 = arith.constant 0 : i32
    %c0_i32_1 = arith.constant 0 : i32
    return %arg0, %c0_i32, %c0_i32_0 : i32, i32, i32
  }
}

</mosaic_0001>

<bundles_post_ra>
// kernel: tpu_custom_call.1
= control target key start
LH: loop header
LB: loop body
LE: loop exit
PB: predicated region body
PF: predicated region fallthrough
CT: control target
= control target key end

     0   :  { %14 = vsyncpa [#allocation3], 0  ;;  %s2343_s0 = inlined_call_operand.vmem [shape: bf16[16,16,64], index: 0, kind: input, shape index: {}]   ;;  %s2344_s1 = inlined_call_operand.vmem [shape: bf16[8,64,8], index: 1, kind: input, shape index: {}]   ;;  %s2345_s2 = inlined_call_operand.vmem [shape: bf16[8,64,8], index: 2, kind: input, shape index: {}]   ;;  %s2346_s3 = inlined_call_operand.vmem [shape: bf16[8,64,8], index: 3, kind: input, shape index: {}]   ;;  %s2347_s4 = inlined_call_operand.vmem [shape: f32[8,1,8], index: 4, kind: input, shape index: {}]   ;;  %s2348_s5 = inlined_call_operand.vmem [shape: f32[8,1,8], index: 5, kind: input, shape index: {}]   ;;  %s2349_s6 = inlined_call_operand.vmem [shape: f32[8,1,8], index: 6, kind: input, shape index: {}]   ;;  %s2350_s7 = inlined_call_operand.vmem [shape: bf16[8,8,64], index: 7, kind: input, shape index: {}]   ;;  %s2351_s8 = inlined_call_operand.vmem [shape: f32[1,64], index: 8, kind: input, shape index: {}]   ;;  %s2352_s9 = inlined_call_operand.hbm [shape: f32[16,16,64], index: 9, kind: output, shape index: {}]  }
   0x1   :  { %16 = vsyncpa [#allocation3 + $0x1], 0  ;;  %s2001_s30 = smov 0   ;;  %s2003_s10 = smov 0  }
   0x2   :  { %s2005_s11 = smov 0   ;;  %s2007_s12 = smov 0  }
   0x3 LB: > { %s2022_s13 = sadd.s32 4294967295, %s1908_s12   ;;  %s1422_s14 = sadd.s32 4294967294, %s1908_s12   ;;  %s1908_s12 = sphi %s2007_s12, %s2366_s12   ;;  %s1904_s11 = sphi %s2005_s11, %s2365_s11   ;;  %s1900_s10 = sphi %s2003_s10, %s2364_s10   ;;  %s1896_s30 = sphi %s2001_s30, %s2363_s30  }
   0x4   : > { %s2026_s15 = sadd.s32 1, %s1908_s12   ;;  %s223_s16 = sadd.s32 1, %s1904_s11 }
   0x5   : > { %s220_s17 = ssub.s32 %s1908_s12, %s2026_s15  ;;  %p233_p0 = scmp.ne.s32.totalorder %s1904_s11, %s1900_s10 }
   0x6   : > { %p221_p1 = scmp.eq.s32.totalorder %s220_s17, 0  ;;  %p234_p2 = scmp.eq.s32.totalorder %s2022_s13, 3 }
   0x7   : > { %p239_p3 = scmp.ne.s32.totalorder %s1900_s10, %s1896_s30  ;;  %p240_p4 = scmp.eq.s32.totalorder %s1422_s14, 3 }
   0x8   : > { %s2037_s18 = scalar_select %p221_p1, %s1904_s11, %s223_s16  }
   0x9   : > { %p2039_p5 = por %p234_p2, %p233_p0  ;;  %p2043_p6 = por %p240_p4, %p239_p3 }
   0xa   : > { %p1425_p7 = scmp.ge.s32.totalorder %s1908_s12, 1  ;;  %p292_p8 = scmp.lt.s32.totalorder %s1908_s12, 5 }
   0xc   : > { %p293_p9 = pnand %p1425_p7, %p292_p8 }
   0xd   : > { %s326_s21 = sand.u32 (!%p293_p9), 1, %s1900_s10   ;;  %s1427_s22 = sshll.u32 (!%p293_p9), %s2022_s13, 2  ;;  %v2074_v8 = vmov (!%p293_p9), 0.0   ;;  %v2076_v9 = vmov (!%p293_p9), 0.0   ;;  %v2078_v10 = vmov (!%p293_p9), 0.0   ;;  %v2080_v11 = vmov (!%p293_p9), 0.0  }
   0xe   : > { %296 = sbr.rel (%p293_p9) target bundleno = 1271 (0x4f7), region = 56  ;;  %s1426_s23 = sshll.u32 (!%p293_p9), %s326_s21, 6  ;;  %v2082_v12 = vmov (!%p293_p9), 0.0   ;;  %v2084_v13 = vmov (!%p293_p9), 0.0   ;;  %v2086_v14 = vmov (!%p293_p9), 0.0   ;;  %v2088_v15 = vmov (!%p293_p9), 0.0  }
   0xf   : > { %p330_p10 = scmp.lt.s32.totalorder (!%p293_p9), %s1427_s22, 15  ;;  %s2072_s28 = scalar_lea.vmem (!%p293_p9), [#allocation2], %s1426_s23 }
  0x10   : > { %s2090_s29 = smov (!%p293_p9), 0  }
  0x15   : > { %s2368_s22 = smov (!%p330_p10, %s1427_s22), 15 }
  0x16   : > { %s1485_s24 = sshll.u32 %s2368_s22, 3 }
  0x17   : > { %s334_s27 = scalar_lea.vmem %s2343_s0, %s1485_s24 }
  0x18   : > { %v2056_v0 = vld [vmem:[%s334_s27] sm:$0xf]  ;;  %v2058_v1 = vld [vmem:[%s334_s27 + $0x4] sm:$0xf]  ;;  %v2060_v2 = vld [vmem:[%s334_s27 + $0x8] sm:$0xf] }
  0x19   : > { %v2062_v3 = vld [vmem:[%s334_s27 + $0xc] sm:$0xf]  ;;  %v2064_v4 = vld [vmem:[%s334_s27 + $0x10] sm:$0xf]  ;;  %v2066_v5 = vld [vmem:[%s334_s27 + $0x14] sm:$0xf] }
  0x1a   : > { %v2068_v6 = vld [vmem:[%s334_s27 + $0x18] sm:$0xf]  ;;  %v2070_v7 = vld [vmem:[%s334_s27 + $0x1c] sm:$0xf] }
  0x1b LB: >> { %v1433_v16 = vcombine.low %v2056_v0, %v2058_v1  ;;  %vm423_vm0 = vcmask 523264   ;;  %s1486_s14 = sshll.u32 %s1944_s29, 5  ;;  %v1434_v26 = vcombine.low %v2060_v2, %v2062_v3  ;;  %v1435_v27 = vcombine.low %v2064_v4, %v2066_v5  ;;  %s1944_s29 = sphi %s2090_s29, %s351_s29   ;;  %v1940_v15 = vphi %v2088_v15, %v2362_v15   ;;  %v1936_v14 = vphi %v2086_v14, %v2361_v14   ;;  %v1932_v13 = vphi %v2084_v13, %v2360_v13   ;;  %v1928_v12 = vphi %v2082_v12, %v2359_v12   ;;  %v1924_v11 = vphi %v2080_v11, %v2358_v11   ;;  %v1920_v10 = vphi %v2078_v10, %v2357_v10   ;;  %v1916_v9 = vphi %v2076_v9, %v2356_v9   ;;  %v1912_v8 = vphi %v2074_v8, %v2355_v8  }
  0x1c   : >> { %s502_s22 = scalar_lea.vmem %s2345_s2, %s1486_s14  ;;  %s362_s25 = scalar_lea.vmem %s2344_s1, %s1486_s14  ;;  %v1436_v30 = vcombine.low %v2068_v6, %v2070_v7  ;;  %v1946_v32 = vmov 0.0   ;;  %vm1947_vm1 = vmmov 0   ;;  %vm727_vm2 = vcmask 64512  }
  0x1d   : >> { %1560 = vmatprep.mubr.msk.bf16.mxu1 %vm423_vm0, %v1433_v16  ;;  %1544 = vmatprep.mubr.msk.bf16.mxu0 %vm423_vm0, %v1433_v16  ;;  %v1766_v17 = vld [vmem:[%s502_s22] sm:$0xff]   ;;  %v1767_v18 = vld [vmem:[%s502_s22 + $0x8] sm:$0xff]   ;;  %v1769_v20 = vld [vmem:[%s502_s22 + $0x10] sm:$0xff]   ;;  %s2133_s16 = scalar_lea.vmem %s2346_s3, %s1486_s14  ;;  %vm916_vm3 = vcmask 130048   ;;  %s1473_s14 = sshll.u32 %s1944_s29, 2  ;;  %vm1204_vm4 = vcmask 1043456  }
  0x1e   : >> { %1552 = vmatprep.subr.bf16.mxu1 %v1766_v17  ;;  %v1768_v19 = vld [vmem:[%s362_s25] sm:$0xff]   ;;  %v1770_v21 = vld [vmem:[%s362_s25 + $0x8] sm:$0xff]   ;;  %v1772_v22 = vld [vmem:[%s362_s25 + $0x10] sm:$0xff]   ;;  %s1190_s23 = scalar_lea.vmem %s2350_s7, %s1473_s14 }
  0x1f   : >> { %1553 = vmatpush3.bf16.msra.mxu1 %v1766_v17  ;;  %1536 = vmatprep.subr.bf16.mxu0 %v1768_v19  ;;  %v1771_v23 = vld [vmem:[%s502_s22 + $0x18] sm:$0xff]   ;;  %v1774_v25 = vld [vmem:[%s2133_s16] sm:$0xff]   ;;  %v1775_v28 = vld [vmem:[%s2133_s16 + $0x8] sm:$0xff]   ;;  %s511_s22 = scalar_lea.vmem %s2348_s5, %s1944_s29 }
  0x20   : >> { %1554 = vmatprep.subr.bf16.mxu1 %v1767_v18  ;;  %1537 = vmatpush3.bf16.msra.mxu0 %v1768_v19  ;;  %v1773_v24 = vld [vmem:[%s362_s25 + $0x18] sm:$0xff]   ;;  %v1776_v29 = vld [vmem:[%s2133_s16 + $0x10] sm:$0xff]   ;;  %s371_s25 = scalar_lea.vmem %s2347_s4, %s1944_s29  ;;  %v1446_v34 = vld [vmem:[%s511_s22] ss:$0 sm:$0xff] }
  0x21   : >> { %1538 = vmatprep.subr.bf16.mxu0 %v1770_v21  ;;  %v1777_v31 = vld [vmem:[%s2133_s16 + $0x18] sm:$0xff]   ;;  %v1432_v35 = vld [vmem:[%s371_s25] ss:$0 sm:$0xff]  ;;  %s618_s16 = scalar_lea.vmem %s2349_s6, %s1944_s29  ;;  %s351_s29 = sadd.s32 1, %s1944_s29  }
  0x22   : >> { %p348_p11 = scmp.ge.s32.totalorder %s351_s29, 8  }
  0x23   : >> { %1555 = vmatpush3.bf16.msra.mxu1 %v1767_v18  ;;  %s1490_s26 = sshll.u32 (%p348_p11), %s2022_s13, 10  ;;  %s1320_s14 = sshll.u32 (%p348_p11), %s2072_s28, 4  ;;  %s2282_s14 = int_to_ptr.vmem [resolvable:$true] %s1320_s14 }
  0x24   : >> { %1556 = vmatprep.subr.bf16.mxu1 %v1769_v20  ;;  %1539 = vmatpush3.bf16.msra.mxu0 %v1770_v21  ;;  %s2302_s13 = scalar_lea.sflag (%p348_p11), [#allocation3], %s326_s21  ;;  %s1810_s17 = scalar_lea.vmem (%p348_p11), %s2282_s14, 1024 }
  0x25   : >> { %1540 = vmatprep.subr.bf16.mxu0 %v1772_v22  ;;  %p1811_p12 = scmp.ne.s32.totalorder (%p348_p11), %s2282_s14, %s1810_s17  ;;  %s1948_s22 = smov (%p348_p11), [#allocation2]  }
  0x27   : >> { %1557 = vmatpush3.bf16.msra.mxu1 %v1769_v20  ;;  %p1812_p13 = pnand (%p348_p11), %p1811_p12, %p2039_p5 }
  0x28   : >> { %1558 = vmatprep.subr.bf16.mxu1 %v1771_v23  ;;  %1541 = vmatpush3.bf16.msra.mxu0 %v1772_v22 }
  0x29   : >> { %1542 = vmatprep.subr.bf16.mxu0 %v1773_v24  ;;  %p1813_p0 = pneg (%p348_p11), %p1812_p13 }
  0x2b   : >> { %1559 = vmatpush3.bf16.msra.mxu1 %v1771_v23 }
  0x2c   : >> { %1642 = vmatprep.subr.bf16.mxu1 %v1774_v25  ;;  %1543 = vmatpush3.bf16.msra.mxu0 %v1773_v24 }
  0x2d   : >> { %1568 = vmatprep.subr.bf16.mxu0 %v1774_v25 }
  0x2e   : >> { %1561 = vmatmul.mubr.msk.bf16.vlgmr.msra.gmra.mrb[0].mxu1 %vm423_vm0, %v1434_v26 }
  0x2f   : >> { %1564 = vmatprep.mubr.msk.bf16.mxu1 %vm423_vm0, %v1435_v27  ;;  %1646 = vmatpush3.bf16.msra.mxu1 %v1774_v25 }
  0x30   : >> { %1545 = vmatmul.mubr.msk.bf16.vlgmr.msra.gmra.mrb[0].mxu0 %vm423_vm0, %v1434_v26  ;;  %1643 = vmatprep.subr.bf16.mxu1 %v1775_v28 }
  0x31   : >> { %1548 = vmatprep.mubr.msk.bf16.mxu0 %vm423_vm0, %v1435_v27  ;;  %1569 = vmatpush3.bf16.msra.mxu0 %v1774_v25 }
  0x32   : >> { %1570 = vmatprep.subr.bf16.mxu0 %v1775_v28 }
  0x33   : >> { %1647 = vmatpush3.bf16.msra.mxu1 %v1775_v28 }
  0x34   : >> { %1644 = vmatprep.subr.bf16.mxu1 %v1776_v29 }
  0x35   : >> { %1571 = vmatpush3.bf16.msra.mxu0 %v1775_v28 }
  0x36   : >> { %1565 = vmatmul.mubr.msk.bf16.gmra.mrb[4].mxu1 %vm423_vm0, %v1436_v30  ;;  %1572 = vmatprep.subr.bf16.mxu0 %v1776_v29 }
  0x37   : >> { %1648 = vmatpush3.bf16.msra.mxu1 %v1776_v29  ;;  %1580 = vmatprep.mubr.msk.bf16.mxu1 %vm423_vm0, %v1435_v27 }
  0x38   : >> { %1549 = vmatmul.mubr.msk.bf16.gmra.mrb[4].mxu0 %vm423_vm0, %v1436_v30  ;;  %1645 = vmatprep.subr.bf16.mxu1 %v1777_v31 }
  0x39   : >> { %1573 = vmatpush3.bf16.msra.mxu0 %v1776_v29  ;;  %1576 = vmatprep.mubr.msk.bf16.mxu0 %vm423_vm0, %v1433_v16 }
  0x3a   : >> { %1574 = vmatprep.subr.bf16.mxu0 %v1777_v31 }
  0x3b   : >> { %1649 = vmatpush3.bf16.msra.mxu1 %v1777_v31 }
  0x3c   : >> { %1584 = vmatprep.subr.bf16.mxu1 %v1946_v32 }
  0x3d   : >> { %1575 = vmatpush3.bf16.msra.mxu0 %v1777_v31 }
  0x3e   : >> { %1581 = vmatmul.mubr.msk.bf16.vlgmr.msra.gmra.mrb[8].mxu1 %vm423_vm0, %v1436_v30  ;;  %1596 = vmatprep.subr.bf16.mxu0 %v1946_v32 }
  0x3f   : >> { %1586 = vmatprep.mubr.msk.bf16.mxu1 %vm1947_vm1, %v1946_v32 }
  0x40   : >> { %1577 = vmatmul.mubr.msk.bf16.vlgmr.msra.gmra.mrb[8].mxu0 %vm423_vm0, %v1434_v26  ;;  %v1456_v26 = vld [vmem:[%s618_s16] ss:$0 sm:$0xff]  ;;  %s2279_s16 = scalar_lea.hbm (%p348_p11), %s2352_s9, %s1490_s26 }
  0x41   : >> { %1598 = vmatprep.mubr.msk.bf16.mxu0 %vm1947_vm1, %v1946_v32 }
 0x101   : >> { %v1562_v33 = vpop.f32.mrb[0].mxu1 }
 0x102   : >> { %v577_v36 = vpop.f32.mrb[1].mxu1  ;;  %v586_v39 = vadd.f32 %v1562_v33, %v1446_v34 }
 0x103   : >> { %v1563_v37 = vpop.f32.mrb[2].mxu1  ;;  %v1546_v38 = vpop.f32.mrb[0].mxu0  ;;  %v578_v44 = vadd.f32 %v1446_v34, %v577_v36 }
 0x104   : >> { %v589_v40 = vadd.f32 %v1563_v37, %v1446_v34  ;;  %v580_v41 = vpop.f32.mrb[3].mxu1  ;;  %v479_v42 = vadd.f32 %v1546_v38, %v1432_v35  ;;  %v470_v43 = vpop.f32.mrb[1].mxu0 }
 0x105   : >> { %v581_v45 = vadd.f32 %v1446_v34, %v580_v41  ;;  %v471_v46 = vadd.f32 %v1432_v35, %v470_v43  ;;  %v1547_v47 = vpop.f32.mrb[2].mxu0 }
 0x106   : >> { %v720_v48 = vpack.c.bf16 %v589_v40, %v586_v39  ;;  %v482_v49 = vadd.f32 %v1547_v47, %v1432_v35  ;;  %v473_v50 = vpop.f32.mrb[3].mxu0 }
 0x107   : >> { %v719_v51 = vpack.c.bf16 %v581_v45, %v578_v44  ;;  %v474_v52 = vadd.f32 %v1432_v35, %v473_v50 }
 0x108   : >> { %v716_v53 = vpack.c.bf16 %v482_v49, %v479_v42  ;;  %v779_v28 = vsel %vm727_vm2, %v720_v48, 0 }
 0x109   : >> { %v1566_v54 = vpop.f32.mrb[4].mxu1  ;;  %v715_v55 = vpack.c.bf16 %v474_v52, %v471_v46  ;;  %v732_v56 = vsel %vm727_vm2, %v719_v51, 0 }
 0x10a   : >> { %v602_v57 = vadd.f32 %v1566_v54, %v1446_v34  ;;  %v593_v58 = vpop.f32.mrb[5].mxu1  ;;  %1585 = vmatpush3.bf16.xpose.msra.mxu1 %v732_v56 }
 0x10b   : >> { %v594_v59 = vadd.f32 %v1446_v34, %v593_v58  ;;  %v1567_v60 = vpop.f32.mrb[6].mxu1  ;;  %v1550_v61 = vpop.f32.mrb[4].mxu0  ;;  %1590 = vmatprep.subr.bf16.mxu1 %v1946_v32 }
 0x10c   : >> { %v605_v62 = vadd.f32 %v1567_v60, %v1446_v34  ;;  %v596_v63 = vpop.f32.mrb[7].mxu1  ;;  %v495_v16 = vadd.f32 %v1550_v61, %v1432_v35  ;;  %v486_v17 = vpop.f32.mrb[5].mxu0 }
 0x10d   : >> { %v597_v18 = vadd.f32 %v1446_v34, %v596_v63  ;;  %v487_v19 = vadd.f32 %v1432_v35, %v486_v17  ;;  %v1551_v20 = vpop.f32.mrb[6].mxu0 }
 0x10e   : >> { %v722_v21 = vpack.c.bf16 %v605_v62, %v602_v57  ;;  %v498_v22 = vadd.f32 %v1551_v20, %v1432_v35  ;;  %v489_v23 = vpop.f32.mrb[7].mxu0 }
 0x10f   : >> { %v721_v24 = vpack.c.bf16 %v597_v18, %v594_v59  ;;  %v490_v25 = vadd.f32 %v1432_v35, %v489_v23 }
 0x110   : >> { %v718_v27 = vpack.c.bf16 %v498_v22, %v495_v16  ;;  %v873_v42 = vsel %vm727_vm2, %v722_v21, 0 }
 0x111   : >> { %1587 = vmatmul.mubr.msk.bf16.vlgmr.msra.gmra.mrb[12].mxu1 %vm727_vm2, %v715_v55  ;;  %v826_v29 = vsel %vm727_vm2, %v721_v24, 0  ;;  %v717_v30 = vpack.c.bf16 %v490_v25, %v487_v19  ;;  %v1582_v31 = vpop.f32.mrb[8].mxu1 }
 0x112   : >> { %1591 = vmatpush3.bf16.xpose.msra.mxu1 %v779_v28  ;;  %1597 = vmatpush3.bf16.xpose.msra.mxu0 %v826_v29  ;;  %v2178_v33 = vadd.f32 %v1582_v31, %v1456_v26  ;;  %v700_v34 = vpop.f32.mrb[9].mxu1 }
 0x113   : >> { %1592 = vmatprep.mubr.msk.bf16.mxu1 %vm1947_vm1, %v1946_v32  ;;  %1602 = vmatprep.subr.bf16.mxu1 %v1946_v32  ;;  %v2183_v35 = vadd.f32 %v1456_v26, %v700_v34  ;;  %v1583_v36 = vpop.f32.mrb[10].mxu1  ;;  %v1578_v43 = vpop.f32.mrb[8].mxu0 }
 0x114   : >> { %v2185_v37 = vadd.f32 %v1583_v36, %v1456_v26  ;;  %v703_v38 = vpop.f32.mrb[11].mxu1  ;;  %1608 = vmatprep.subr.bf16.mxu0 %v1946_v32  ;;  %v693_v44 = vadd.f32 %v1578_v43, %v1456_v26  ;;  %v684_v45 = vpop.f32.mrb[9].mxu0 }
 0x115   : >> { %v2188_v39 = vadd.f32 %v1456_v26, %v703_v38  ;;  %v685_v46 = vadd.f32 %v1456_v26, %v684_v45  ;;  %v1579_v47 = vpop.f32.mrb[10].mxu0 }
 0x116   : >> { %v726_v40 = vpack.c.bf16 %v2185_v37, %v2178_v33  ;;  %v696_v48 = vadd.f32 %v1579_v47, %v1456_v26  ;;  %v687_v49 = vpop.f32.mrb[11].mxu0  ;;  %v1191_v33 = vld [vmem:[%s1190_s23] sm:$0xf]  ;;  %s1814_s23 = sshll.u32 (%p348_p11), %s1948_s22, 4  ;;  %s1815_s23 = int_to_ptr.vmem [resolvable:$false] %s1814_s23 }
 0x117   : >> { %v725_v41 = vpack.c.bf16 %v2188_v39, %v2183_v35  ;;  %v688_v50 = vadd.f32 %v1456_v26, %v687_v49  ;;  %v1206_v37 = vsel %vm1204_vm4, %v1191_v33, 0  ;;  %s1816_s24 = scalar_lea.vmem (%p348_p11), %s1815_s23, 2048  ;;  %p1817_p1 = scmp.lt.s32.totalorder (%p348_p11), %s2282_s14, %s1815_s23 }
 0x118   : >> { %v724_v51 = vpack.c.bf16 %v696_v48, %v693_v44  ;;  %p1818_p2 = scmp.lt.s32.totalorder (%p348_p11), %s1816_s24, %s1810_s17 }
 0x119   : >> { %1593 = vmatmul.mubr.msk.bf16.vlgmr.msra.gmra.mrb[16].mxu1 %vm727_vm2, %v716_v53  ;;  %1599 = vmatmul.mubr.msk.bf16.vlgmr.msra.gmra.mrb[12].mxu0 %vm727_vm2, %v717_v30  ;;  %v723_v52 = vpack.c.bf16 %v688_v50, %v685_v46 }
 0x11a   : >> { %1603 = vmatpush3.bf16.xpose.msra.mxu1 %v873_v42  ;;  %1604 = vmatprep.mubr.msk.bf16.mxu1 %vm1947_vm1, %v1946_v32  ;;  %p1819_p3 = por (%p348_p11), %p1818_p2, %p1817_p1 }
 0x11b   : >> { %1614 = vmatprep.subr.bf16.mxu1 %v1946_v32  ;;  %1610 = vmatprep.mubr.msk.bf16.mxu0 %vm1947_vm1, %v1946_v32 }
 0x11c   : >> { %1609 = vmatpush3.bf16.msra.mxu0 %v723_v52  ;;  %p1820_p4 = pnand (%p348_p11), %p1819_p3, %p1813_p0 }
 0x11d   : >> { %1620 = vmatprep.subr.bf16.mxu0 %v1946_v32 }
 0x121   : >> { %1605 = vmatmul.mubr.msk.bf16.vlgmr.msra.gmra.mrb[20].mxu1 %vm727_vm2, %v718_v27 }
 0x122   : >> { %1616 = vmatprep.mubr.msk.bf16.mxu1 %vm1947_vm1, %v1946_v32  ;;  %1615 = vmatpush3.bf16.msra.mxu1 %v724_v51 }
 0x123   : >> { %1626 = vmatprep.subr.bf16.mxu1 %v1946_v32 }
 0x1e4   : >> { %v768_v53 = vpop.f32.mrb[12].mxu1 }
 0x1e5   : >> { %v1588_v54 = vpop.f32.mrb[13].mxu1  ;;  %v917_v55 = vsel %vm916_vm3, %v768_v53, -inf }
 0x1e6   : >> { %918 = vmax.xlane.f32.xlu0 %v917_v55  ;;  %v771_v56 = vpop.f32.mrb[14].mxu1 }
 0x1e7   : >> { %v1589_v57 = vpop.f32.mrb[15].mxu1  ;;  %v920_v58 = vsel %vm916_vm3, %v771_v56, -inf }
 0x1ea   : >> { %921 = vmax.xlane.f32.xlu0 %v920_v58 }
 0x1ec   : >> { %v815_v59 = vpop.f32.mrb[16].mxu1  ;;  %v862_v60 = vpop.f32.mrb[12].mxu0 }
 0x1ed   : >> { %v1594_v61 = vpop.f32.mrb[17].mxu1  ;;  %v1600_v62 = vpop.f32.mrb[13].mxu0  ;;  %v929_v63 = vsel %vm916_vm3, %v862_v60, -inf  ;;  %v923_v16 = vsel %vm916_vm3, %v815_v59, -inf }
 0x1ee   : >> { %930 = vmax.xlane.f32.xlu0 %v929_v63  ;;  %924 = vmax.xlane.f32.xlu1 %v923_v16  ;;  %v818_v17 = vpop.f32.mrb[18].mxu1  ;;  %v865_v18 = vpop.f32.mrb[14].mxu0 }
 0x1ef   : >> { %v1595_v19 = vpop.f32.mrb[19].mxu1  ;;  %v1601_v20 = vpop.f32.mrb[15].mxu0  ;;  %v926_v21 = vsel %vm916_vm3, %v818_v17, -inf  ;;  %v932_v24 = vsel %vm916_vm3, %v865_v18, -inf }
 0x1f2   : >> { %927 = vmax.xlane.f32.xlu1 %v926_v21 }
 0x1f4   : >> { %v909_v22 = vpop.f32.mrb[20].mxu1 }
 0x1f5   : >> { %v1606_v23 = vpop.f32.mrb[21].mxu1  ;;  %v935_v25 = vsel %vm916_vm3, %v909_v22, -inf }
 0x1f6   : >> { %933 = vmax.xlane.f32.xlu1 %v932_v24  ;;  %936 = vmax.xlane.f32.xlu0 %v935_v25  ;;  %v912_v26 = vpop.f32.mrb[22].mxu1 }
 0x1f7   : >> { %v1607_v27 = vpop.f32.mrb[23].mxu1  ;;  %v938_v28 = vsel %vm916_vm3, %v912_v26, -inf }
 0x1fa   : >> { %939 = vmax.xlane.f32.xlu1 %v938_v28 }
 0x273   : >> { %v919_v29 = vpop.xlane.xlu0 %918 }
 0x274   : >> { %v941_v30 = vsub.f32 %v768_v53, %v919_v29 }
 0x276   : >> { %v949_v31 = vmul.f32 1.442695, %v941_v30 }
 0x277   : >> { %v922_v34 = vpop.xlane.xlu0 %921 }
 0x278   : >> { %1778 = vpow2.f32 %v949_v31  ;;  %v942_v36 = vsub.f32 %v771_v56, %v922_v34 }
 0x27a   : >> { %v951_v38 = vmul.f32 1.442695, %v942_v36 }
 0x27b   : >> { %v931_v42 = vpop.xlane.xlu0 %930  ;;  %v925_v43 = vpop.xlane.xlu1 %924 }
 0x27c   : >> { %1780 = vpow2.f32 %v951_v38  ;;  %v945_v44 = vsub.f32 %v862_v60, %v931_v42  ;;  %v943_v45 = vsub.f32 %v815_v59, %v925_v43 }
 0x27e   : >> { %v953_v46 = vmul.f32 1.442695, %v943_v45  ;;  %v957_v47 = vmul.f32 1.442695, %v945_v44 }
 0x27f   : >> { %v928_v48 = vpop.xlane.xlu1 %927 }
 0x280   : >> { %v944_v49 = vsub.f32 %v818_v17, %v928_v48  ;;  %1782 = vpow2.f32 %v953_v46 }
 0x281   : >> { %1784 = vpow2.f32 %v957_v47 }
 0x282   : >> { %v1779_v50 = vpop.eup %1778  ;;  %v955_v51 = vmul.f32 1.442695, %v944_v49 }
 0x283   : >> { %v934_v52 = vpop.xlane.xlu1 %933  ;;  %v937_v53 = vpop.xlane.xlu0 %936  ;;  %v965_v54 = vsel %vm916_vm3, %v1779_v50, 0.0 }
 0x284   : >> { %1786 = vpow2.f32 %v955_v51  ;;  %v946_v55 = vsub.f32 %v865_v18, %v934_v52  ;;  %v947_v56 = vsub.f32 %v909_v22, %v937_v53  ;;  %966 = vadd.xlane.f32.xlu0 %v965_v54 }
 0x286   : >> { %v1781_v57 = vpop.eup %1780  ;;  %v959_v58 = vmul.f32 1.442695, %v946_v55  ;;  %v961_v60 = vmul.f32 1.442695, %v947_v56 }
 0x287   : >> { %v940_v59 = vpop.xlane.xlu1 %939  ;;  %v968_v61 = vsel %vm916_vm3, %v1781_v57, 0.0 }
 0x288   : >> { %1788 = vpow2.f32 %v959_v58  ;;  %v948_v62 = vsub.f32 %v912_v26, %v940_v59  ;;  %969 = vadd.xlane.f32.xlu1 %v968_v61 }
 0x289   : >> { %1790 = vpow2.f32 %v961_v60 }
 0x28a   : >> { %v963_v63 = vmul.f32 1.442695, %v948_v62  ;;  %v1783_v16 = vpop.eup %1782 }
 0x28b   : >> { %v971_v17 = vsel %vm916_vm3, %v1783_v16, 0.0  ;;  %v1785_v19 = vpop.eup %1784 }
 0x28c   : >> { %1792 = vpow2.f32 %v963_v63  ;;  %972 = vadd.xlane.f32.xlu0 %v971_v17  ;;  %v977_v21 = vsel %vm916_vm3, %v1785_v19, 0.0 }
 0x28e   : >> { %v1787_v18 = vpop.eup %1786 }
 0x28f   : >> { %v974_v20 = vsel %vm916_vm3, %v1787_v18, 0.0 }
 0x290   : >> { %975 = vadd.xlane.f32.xlu1 %v974_v20  ;;  %978 = vadd.xlane.f32.xlu0 %v977_v21 }
 0x292   : >> { %v1789_v22 = vpop.eup %1788 }
 0x293   : >> { %v1791_v23 = vpop.eup %1790  ;;  %v980_v24 = vsel %vm916_vm3, %v1789_v22, 0.0 }
 0x294   : >> { %v983_v25 = vsel %vm916_vm3, %v1791_v23, 0.0  ;;  %981 = vadd.xlane.f32.xlu1 %v980_v24 }
 0x295   : >> { %984 = vadd.xlane.f32.xlu0 %v983_v25 }
 0x296   : >> { %v1793_v26 = vpop.eup %1792 }
 0x297   : >> { %v986_v27 = vsel %vm916_vm3, %v1793_v26, 0.0 }
 0x298   : >> { %987 = vadd.xlane.f32.xlu1 %v986_v27 }
 0x311   : >> { %v967_v28 = vpop.xlane.xlu0 %966 }
 0x312   : >> { %1794 = vrcp.f32 %v967_v28 }
 0x315   : >> { %v970_v29 = vpop.xlane.xlu1 %969 }
 0x316   : >> { %1796 = vrcp.f32 %v970_v29 }
 0x319   : >> { %v973_v30 = vpop.xlane.xlu0 %972 }
 0x31a   : >> { %1798 = vrcp.f32 %v973_v30 }
 0x31c   : >> { %v1795_v34 = vpop.eup %1794 }
 0x31d   : >> { %v976_v31 = vpop.xlane.xlu1 %975  ;;  %v979_v36 = vpop.xlane.xlu0 %978  ;;  %v997_v42 = vmul.f32 %v1795_v34, %v1779_v50 }
 0x31e   : >> { %1800 = vrcp.f32 %v976_v31 }
 0x31f   : >> { %1802 = vrcp.f32 %v979_v36 }
 0x320   : >> { %v1797_v38 = vpop.eup %1796 }
 0x321   : >> { %v998_v43 = vmul.f32 %v1797_v38, %v1781_v57  ;;  %v982_v44 = vpop.xlane.xlu1 %981 }
 0x322   : >> { %v985_v45 = vpop.xlane.xlu0 %984  ;;  %1804 = vrcp.f32 %v982_v44 }
 0x323   : >> { %v1005_v46 = vpack.c.bf16 %v998_v43, %v997_v42  ;;  %1806 = vrcp.f32 %v985_v45 }
 0x324   : >> { %v1799_v48 = vpop.eup %1798 }
 0x325   : >> { %1611 = vmatmul.mubr.msk.bf16.vlgmr.msra.gmra.mrb[16].mxu0 %vm916_vm3, %v1005_v46  ;;  %v988_v47 = vpop.xlane.xlu1 %987  ;;  %v999_v50 = vmul.f32 %v1799_v48, %v1783_v16 }
 0x326   : >> { %1621 = vmatpush3.bf16.msra.mxu0 %v725_v41  ;;  %1808 = vrcp.f32 %v988_v47  ;;  %1622 = vmatprep.mubr.msk.bf16.mxu0 %vm1947_vm1, %v1946_v32 }
 0x327   : >> { %1650 = vmatprep.subr.msk.bf16.mxu0 %vm1204_vm4, %v1191_v33 }
 0x328   : >> { %v1801_v49 = vpop.eup %1800 }
 0x329   : >> { %v1000_v51 = vmul.f32 %v1801_v49, %v1787_v18  ;;  %v1803_v52 = vpop.eup %1802 }
 0x32a   : >> { %v1001_v55 = vmul.f32 %v1803_v52, %v1785_v19 }
 0x32b   : >> { %v1006_v53 = vpack.c.bf16 %v1000_v51, %v999_v50 }
 0x32c   : >> { %v1805_v54 = vpop.eup %1804 }
 0x32d   : >> { %v1002_v56 = vmul.f32 %v1805_v54, %v1789_v22  ;;  %1617 = vmatmul.mubr.msk.bf16.vlgmr.msra.gmra.mrb[24].mxu1 %vm916_vm3, %v1006_v53  ;;  %v1807_v57 = vpop.eup %1806 }
 0x32e   : >> { %1627 = vmatpush3.bf16.msra.mxu1 %v726_v40  ;;  %1628 = vmatprep.mubr.msk.bf16.mxu1 %vm1947_vm1, %v1946_v32  ;;  %v1003_v41 = vmul.f32 %v1807_v57, %v1791_v23 }
 0x32f   : >> { %v1007_v35 = vpack.c.bf16 %v1002_v56, %v1001_v55 }
 0x330   : >> { %v1809_v39 = vpop.eup %1808 }
 0x331   : >> { %v1004_v58 = vmul.f32 %v1809_v39, %v1793_v26  ;;  %1623 = vmatmul.mubr.msk.bf16.vlgmr.msra.gmra.mrb[20].mxu0 %vm916_vm3, %v1007_v35 }
 0x332   : >> { %1633 = vmatpush3.bf16.msra.mxu0 %v1206_v37 }
 0x333   : >> { %v1008_v60 = vpack.c.bf16 %v1004_v58, %v1003_v41 }
 0x335   : >> { %1629 = vmatmul.mubr.msk.bf16.vlgmr.msra.gmra.mrb[28].mxu1 %vm916_vm3, %v1008_v60 }
 0x3f8   : >> { %v1046_v32 = vpop.f32.mrb[16].mxu0 }
 0x3f9   : >> { %v1612_v40 = vpop.f32.mrb[17].mxu0 }
 0x3fa   : >> { %v1049_v59 = vpop.f32.mrb[18].mxu0 }
 0x3fb   : >> { %v1185_v61 = vpack.c.bf16 %v1049_v59, %v1046_v32  ;;  %v1613_v62 = vpop.f32.mrb[19].mxu0 }
 0x3fd   : >> { %1634 = vmatprep.mubr.msk.bf16.mxu0 %vm727_vm2, %v1185_v61 }
 0x400   : >> { %v1090_v63 = vpop.f32.mrb[24].mxu1 }
 0x401   : >> { %v1618_v16 = vpop.f32.mrb[25].mxu1 }
 0x402   : >> { %v1093_v17 = vpop.f32.mrb[26].mxu1 }
 0x403   : >> { %v1186_v19 = vpack.c.bf16 %v1093_v17, %v1090_v63  ;;  %v1619_v18 = vpop.f32.mrb[27].mxu1 }
 0x404   : >> { %v1134_v20 = vpop.f32.mrb[20].mxu0 }
 0x405   : >> { %v1624_v21 = vpop.f32.mrb[21].mxu0  ;;  %1635 = vmatmul.mubr.msk.bf16.vlgmr.msra.gmra.mrb[24].mxu0 %vm727_vm2, %v1186_v19 }
 0x406   : >> { %v1137_v22 = vpop.f32.mrb[22].mxu0 }
 0x407   : >> { %v1187_v23 = vpack.c.bf16 %v1137_v22, %v1134_v20  ;;  %v1625_v24 = vpop.f32.mrb[23].mxu0 }
 0x408   : >> { %v1178_v25 = vpop.f32.mrb[28].mxu1 }
 0x409   : >> { %v1630_v26 = vpop.f32.mrb[29].mxu1  ;;  %1638 = vmatprep.mubr.msk.bf16.mxu0 %vm727_vm2, %v1187_v23 }
 0x40a   : >> { %v1181_v27 = vpop.f32.mrb[30].mxu1 }
 0x40b   : >> { %v1188_v28 = vpack.c.bf16 %v1181_v27, %v1178_v25  ;;  %v1631_v29 = vpop.f32.mrb[31].mxu1 }
 0x40d   : >> { %1639 = vmatmul.mubr.msk.bf16.gmra.mrb[28].mxu0 %vm727_vm2, %v1188_v28 }
 0x4d8   : >> { %v1636_v30 = vpop.f32.mrb[24].mxu0 }
 0x4d9   : >> { %v1275_v31 = vadd.f32 %v1932_v13, %v1636_v30   ;;  %v1242_v34 = vpop.f32.mrb[25].mxu0 }
 0x4da   : >> { %v1273_v36 = vadd.f32 %v1940_v15, %v1242_v34   ;;  %v1637_v38 = vpop.f32.mrb[26].mxu0 }
 0x4db   : >> { %v1276_v42 = vadd.f32 %v1928_v12, %v1637_v38   ;;  %v1245_v43 = vpop.f32.mrb[27].mxu0  ;;  %v2360_v13 = vmov %v1275_v31 }
 0x4dc   : >> { %v1274_v44 = vadd.f32 %v1936_v14, %v1245_v43   ;;  %v2362_v15 = vmov %v1273_v36 }
 0x4dd   : >> { %v2359_v12 = vmov %v1276_v42  ;;  %v1478_v15 = vld [vmem:[%s2351_s8] ss:$0 sm:$0xff] (%p348_p11) }
 0x4de   : >> { %v2361_v14 = vmov %v1274_v44  ;;  %v1288_v53 = vadd.f32 (%p348_p11), %v1478_v15, %v1273_v36  ;;  %v1289_v54 = vadd.f32 (%p348_p11), %v1478_v15, %v1274_v44  ;;  %v1290_v55 = vadd.f32 (%p348_p11), %v1478_v15, %v1275_v31 }
 0x4df   : > { %v1291_v56 = vadd.f32 (%p348_p11), %v1478_v15, %v1276_v42 }
 0x4e0   : >> { %v1640_v45 = vpop.f32.mrb[28].mxu0  ;;  %350 = sbr.rel (!%p348_p11) target bundleno = 27 (0x1b), region = 105  ;;  %1297 = vst.msk [vmem:[%s2072_s28] sm:$0xff] (%p348_p11), %vm423_vm0, %v1288_v53  ;;  %1298 = vst.msk [vmem:[%s2072_s28 + $0x8] sm:$0xff] (%p348_p11), %vm423_vm0, %v1289_v54 }
 0x4e1   : >> { %v1279_v46 = vadd.f32 %v1916_v9, %v1640_v45   ;;  %v1258_v47 = vpop.f32.mrb[29].mxu0  ;;  %1299 = vst.msk [vmem:[%s2072_s28 + $0x10] sm:$0xff] (%p348_p11), %vm423_vm0, %v1290_v55  ;;  %1300 = vst.msk [vmem:[%s2072_s28 + $0x18] sm:$0xff] (%p348_p11), %vm423_vm0, %v1291_v56 }
 0x4e2   : >> { %v1277_v48 = vadd.f32 %v1924_v11, %v1258_v47   ;;  %v1641_v49 = vpop.f32.mrb[30].mxu0 }
 0x4e3   : >> { %v1280_v50 = vadd.f32 %v1912_v8, %v1641_v49   ;;  %v1261_v51 = vpop.f32.mrb[31].mxu0  ;;  %v2356_v9 = vmov %v1279_v46  ;;  %v1294_v2 = vadd.f32 (%p348_p11), %v1478_v15, %v1279_v46 }
 0x4e4   : >> { %v1278_v52 = vadd.f32 %v1920_v10, %v1261_v51   ;;  %v2358_v11 = vmov %v1277_v48  ;;  %v1292_v0 = vadd.f32 (%p348_p11), %v1478_v15, %v1277_v48 }
 0x4e5   : >> { %v2355_v8 = vmov %v1280_v50  ;;  %v1295_v3 = vadd.f32 (%p348_p11), %v1478_v15, %v1280_v50  ;;  %1303 = vst.msk [vmem:[%s2072_s28 + $0x30] sm:$0xff] (%p348_p11), %vm423_vm0, %v1294_v2 }
 0x4e6   : >> { %v2357_v10 = vmov %v1278_v52  ;;  %v1293_v1 = vadd.f32 (%p348_p11), %v1478_v15, %v1278_v52  ;;  %1301 = vst.msk [vmem:[%s2072_s28 + $0x20] sm:$0xff] (%p348_p11), %vm423_vm0, %v1292_v0 }
 0x4e7   : > { %1304 = vst.msk [vmem:[%s2072_s28 + $0x38] sm:$0xff] %vm423_vm0, %v1295_v3 }
 0x4e8   : > { %1302 = vst.msk [vmem:[%s2072_s28 + $0x28] sm:$0xff] %vm423_vm0, %v1293_v1 }
 0x4e9   : > { %1823 = shalt.err (!%p1820_p4)
}
 0x4ea   : > { %s1824_s21 = scalar_lea.hbm %s2279_s16, 1024  ;;  %s1828_s26 = scalar_lea.hbm %s2352_s9, 4096 }
 0x4eb   : > { %p1825_p7 = scmp.ne.s32.totalorder %s2279_s16, %s1824_s21  ;;  %p1829_p10 = scmp.lt.u32.totalorder %s2279_s16, %s2352_s9 }
 0x4ec   : > { %p1830_p11 = scmp.lt.u32.totalorder %s1828_s26, %s1824_s21  ;;  %p1832_p13 = scmp.lt.u32.totalorder %s1824_s21, %s2279_s16 }
 0x4ed   : > { %p1826_p8 = pnand %p1825_p7, %p2039_p5 }
 0x4ee   : > { %p1831_p12 = por %p1830_p11, %p1829_p10 }
 0x4ef   : > { %p1827_p9 = pneg %p1826_p8 }
 0x4f0   : > { %p1833_p0 = por %p1832_p13, %p1831_p12 }
 0x4f2   : > { %p1834_p1 = pnand %p1833_p0, %p1827_p9 }
 0x4f4   : > { %1837 = shalt.err (!%p1834_p1)
}
 0x4f5   : > { %s1949_s17 = smov 128   ;;  %s1950_s22 = smov 8  }
 0x4f6   : > { %1651 = dma.vmem_to_hbm [thread:$0]  (%p2039_p5), %s2282_s14, 1024, %s2279_s16, %s2302_s13, %s1949_s17, %s1949_s17, %s1950_s22  }
 0x4f7 PF: > { %p1657_p2 = scmp.ge.s32.totalorder %s1908_s12, 2  ;;  %s1335_s23 = sand.u32 1, %s1896_s30  }
 0x4f8   : > { %s1336_s24 = scalar_lea.sflag [#allocation3], %s1335_s23 }
 0x4f9   : > { %p1654_p3 = pnand %p1657_p2, %p2043_p6 }
 0x4fb   : > { %1891 = dma.done.wait (!%p1654_p3), %s1336_s24, 1024  }
 0x4fc   : > { %1893 = vsyncadd (!%p1654_p3), %s1336_s24, 4294966272  ;;  %p19_p4 = scmp.ge.s32.totalorder %s2026_s15, 6   ;;  %s2363_s30 = smov %s1900_s10 }
 0x4fd   : > { %s2364_s10 = smov %s1904_s11  ;;  %s2365_s11 = smov %s2037_s18 }
 0x4fe   : > { %s2366_s12 = smov %s2026_s15  ;;  %21 = sbr.rel (!%p19_p4) target bundleno = 3 (0x3), region = 116 }
 0x505   :  { %1341 = vsyncpa [#allocation3], 1 }
 0x506   :  { %1343 = vsyncpa [#allocation3 + $0x1], 1 }

</bundles_post_ra>
